<compile_context>
chip_gen: v6e
topology: v6e:2x2x1
jax: 0.10.0
libtpu: 0.0.40
codegen_flags: <defaults>
</compile_context>

<pallas_src>
import jax
import jax.numpy as jnp
from jax.experimental import pallas as pl
from jax.experimental.pallas import tpu as pltpu


# ---------------------------------------------------------------------------
# Path 1 (default): aliased no-op — no data movement at all.
# ---------------------------------------------------------------------------
def _noop_kernel(x_hbm_ref, o_hbm_ref):
    # nn.Identity moves no data.  The output aliases the input buffer and both
    # refs stay in HBM (memory_space=pl.ANY), so no HBM<->VMEM DMA is emitted.
    del x_hbm_ref, o_hbm_ref


def _identity_alias(x):
    return pl.pallas_call(
        _noop_kernel,
        out_shape=jax.ShapeDtypeStruct(x.shape, x.dtype),
        in_specs=[pl.BlockSpec(memory_space=pl.ANY)],
        out_specs=pl.BlockSpec(memory_space=pl.ANY),
        input_output_aliases={0: 0},
    )(x)


# ---------------------------------------------------------------------------
# Path 2 (copy=True): lane-dense streaming copy (independent output buffer).
# ---------------------------------------------------------------------------
def _copy_kernel(x_ref, o_ref):
    # Straight tile copy; Pallas double-buffers the HBM<->VMEM DMAs around it.
    o_ref[...] = x_ref[...]


_TARGET_TILE_BYTES = 4 * 1024 * 1024   # ~4 MiB / buffer: amortizes the ~0.35 us
                                       # per-grid-step overhead on every chip.
_VMEM_LIMIT_BYTES = 32 * 1024 * 1024   # 2 arrays x 2 buffers x 4 MiB = 16 MiB
                                       # used; 32 MiB stays inside v7x's 64 MiB
                                       # physical VMEM and lifts v5e's 16 MiB
                                       # scoped default.


def _pick_lanes(total):
    """Widest lane count (multiple of 128) that divides `total`."""
    for lanes in (4096, 2048, 1024, 512, 256, 128):
        if total % lanes == 0:
            return lanes
    return None


def _copy_lane_dense(flat):
    """Copy a 1-D, 128-divisible array as a lane-dense (rows, lanes) slab."""
    total = flat.shape[0]
    lanes = _pick_lanes(total)
    rows = total // lanes
    x2d = flat.reshape(rows, lanes)

    itemsize = jnp.dtype(flat.dtype).itemsize
    row_tile = _TARGET_TILE_BYTES // (lanes * itemsize)      # dtype-aware
    row_tile = max(32, (row_tile // 32) * 32)                 # sublane multiple
    row_tile = min(row_tile, rows)
    if row_tile == rows or rows <= 32:
        row_tile = rows                                       # single full block

    grid = (pl.cdiv(rows, row_tile),)
    out2d = pl.pallas_call(
        _copy_kernel,
        out_shape=jax.ShapeDtypeStruct((rows, lanes), flat.dtype),
        grid=grid,
        in_specs=[pl.BlockSpec((row_tile, lanes), lambda i: (i, 0))],
        out_specs=pl.BlockSpec((row_tile, lanes), lambda i: (i, 0)),
        compiler_params=pltpu.CompilerParams(
            dimension_semantics=("parallel",),     # megacore sharding on v7x
            vmem_limit_bytes=_VMEM_LIMIT_BYTES,
        ),
    )(x2d)
    return out2d.reshape(total)


def _copy_small(flat_tail):
    """Copy a tiny (<128 element) tail as a single full block."""
    n = flat_tail.shape[0]
    out = pl.pallas_call(
        _copy_kernel,
        out_shape=jax.ShapeDtypeStruct((1, n), flat_tail.dtype),
    )(flat_tail.reshape(1, n))
    return out.reshape(n)


def _identity_copy(x):
    orig_shape = x.shape
    flat = x.reshape(-1)
    total = flat.shape[0]
    rem = total % 128
    if rem == 0:
        return _copy_lane_dense(flat).reshape(orig_shape)
    # Non-128-multiple: tiled 128-aligned prefix + tiny tail block instead of
    # staging the whole array in VMEM (robustness fix from the review).
    prefix = total - rem
    parts = []
    if prefix > 0:
        parts.append(_copy_lane_dense(flat[:prefix]))
    parts.append(_copy_small(flat[prefix:]))
    return jnp.concatenate(parts).reshape(orig_shape)


# ---------------------------------------------------------------------------
# Public entry point.
# ---------------------------------------------------------------------------
def identity_forward(x, *, copy=False):
    """Pallas implementation of nn.Identity.forward.

    copy=False (default): output aliases the input buffer (no data movement;
        donate the input under jit for true zero-copy, like PyTorch returning
        the same tensor object).
    copy=True: returns an independent copy via a lane-dense streaming kernel.
    """
    if x.size == 0:
        return x
    if copy:
        return _identity_copy(x)
    try:
        return _identity_alias(x)
    except Exception:  # defensive: fall back to a real copy if the aliased
        # no-op path is rejected by a given toolchain.
        # TODO(synk): drop this fallback once the aliased path is verified
        # everywhere.
        return _identity_copy(x)


if __name__ == "__main__":
    key = jax.random.PRNGKey(0)
    N, C, H, W = 2, 4, 16, 16
    x = jax.random.normal(key, (N, C, H, W), jnp.float32)  # NCHW, like torch

    # Default path: aliased, no data movement.
    out = jax.block_until_ready(identity_forward(x))
    assert out.shape == x.shape
    assert out.dtype == x.dtype
    assert jnp.array_equal(out, x), "Identity output must equal input exactly"

    # Explicit-copy path: independent buffer via the tiled streaming kernel.
    out_copy = jax.block_until_ready(identity_forward(x, copy=True))
    assert out_copy.shape == x.shape
    assert out_copy.dtype == x.dtype
    assert jnp.array_equal(out_copy, x), "Copy path must reproduce the input"

    print("KERNEL_OK")
</pallas_src>

<mosaic_0001>
module attributes {stable_mosaic.version = 11 : i64} {
  func.func @_noop_kernel(%arg0: memref<2x4x16x16xf32, #tpu.memory_space<any>>, %arg1: memref<2x4x16x16xf32, #tpu.memory_space<any>>) attributes {dimension_semantics = [], scalar_prefetch = 0 : i64, scratch_operands = 0 : i64, tpu.core_type = #tpu.core_type<tc>} {
    return
  }
}

module attributes {stable_mosaic.version = 11 : i64} {
  func.func @_copy_kernel(%arg0: i32, %arg1: memref<1x2048xf32, #tpu.memory_space<vmem>>, %arg2: memref<1x2048xf32, #tpu.memory_space<vmem>>) attributes {dimension_semantics = [#tpu.dimension_semantics<parallel>], iteration_bounds = array<i64: 1>, scalar_prefetch = 0 : i64, scratch_operands = 0 : i64, tpu.core_type = #tpu.core_type<tc>, window_params = [{transform_indices = @transform_0, window_bounds = array<i64: 1, 2048>}, {transform_indices = @transform_1, window_bounds = array<i64: 1, 2048>}]} {
    %c0 = arith.constant 0 : index
    %c0_0 = arith.constant 0 : index
    %0 = vector.load %arg1[%c0, %c0_0] : memref<1x2048xf32, #tpu.memory_space<vmem>>, vector<1x2048xf32>
    %c0_1 = arith.constant 0 : index
    %c0_2 = arith.constant 0 : index
    %1 = vector.load %arg2[%c0_1, %c0_2] : memref<1x2048xf32, #tpu.memory_space<vmem>>, vector<1x2048xf32>
    tpu.vector_store %arg2[%c0_1, %c0_2], %0 {strides = array<i32>} : memref<1x2048xf32, #tpu.memory_space<vmem>>, vector<1x2048xf32>,
    return
  }
  func.func @transform_0(%arg0: i32) -> (i32, i32) {
    %c0_i32 = arith.constant 0 : i32
    %c0_i32_0 = arith.constant 0 : i32
    return %arg0, %c0_i32 : i32, i32
  }
  func.func @transform_1(%arg0: i32) -> (i32, i32) {
    %c0_i32 = arith.constant 0 : i32
    %c0_i32_0 = arith.constant 0 : i32
    return %arg0, %c0_i32 : i32, i32
  }
}

</mosaic_0001>

<bundles_post_ra>
// kernel: tpu_custom_call.1
= control target key start
LH: loop header
LB: loop body
LE: loop exit
PB: predicated region body
PF: predicated region fallthrough
CT: control target
= control target key end

     0   :  { %s16_s0 = inlined_call_operand.hbm [shape: f32[2,4,16,16], index: 0, kind: input, shape index: {}, may-alias: {0,1}]   ;;  %s17_s1 = inlined_call_operand.hbm [shape: f32[2,4,16,16], index: 1, kind: output, shape index: {}, may-alias: {0,1}]  }

// kernel: tpu_custom_call.1
= control target key start
LH: loop header
LB: loop body
LE: loop exit
PB: predicated region body
PF: predicated region fallthrough
CT: control target
= control target key end

     0   :  { %6 = vsyncpa [#allocation3], 0  ;;  %s104_s0 = inlined_call_operand.hbm [shape: f32[1,2048], index: 0, kind: input, shape index: {}]   ;;  %s105_s1 = inlined_call_operand.hbm [shape: f32[1,2048], index: 1, kind: output, shape index: {}]  }
   0x1   :  { %7 = vsyncpa [#allocation4], 0  ;;  %s86_s6 = smov [#allocation2]  }
   0x2   :  { %s14_s7 = sshll.u32 %s86_s6, 4  ;;  %s15_s7 = int_to_ptr.vmem [resolvable:$true] %s14_s7 }
   0x3   :  { %s50_s8 = scalar_lea.vmem %s15_s7, 256  ;;  %p55_p1 = scmp.lt.s32.totalorder %s15_s7, %s15_s7 }
   0x4   :  { %p51_p0 = scmp.ne.s32.totalorder %s15_s7, %s50_s8  ;;  %p56_p2 = scmp.lt.s32.totalorder %s50_s8, %s50_s8 }
   0x6   :  { %p57_p3 = por %p56_p2, %p55_p1 }
   0x8   :  { %p58_p4 = pnand %p57_p3, %p51_p0 }
   0xa   :  { %61 = shalt.err (!%p58_p4)
}
   0xb   :  { %17 = dma.hbm_to_vmem [thread:$0]  %s104_s0, 256, %s15_s7, [#allocation3]  }
   0xc   :  { %82 = dma.done.wait [#allocation3], 256  }
   0xd   :  { %83 = vsyncadd [#allocation3], 4294967040  ;;  %s87_s11 = smov [#allocation5]   ;;  %v21_v0 = vld [vmem:[#allocation2] sm:$0xff]  ;;  %v22_v1 = vld [vmem:[#allocation2 + $0x8] sm:$0xff] }
   0xe   :  { %s31_s12 = sshll.u32 %s87_s11, 4  ;;  %23 = vst [vmem:[#allocation5] sm:$0xff] %v21_v0  ;;  %24 = vst [vmem:[#allocation5 + $0x8] sm:$0xff] %v22_v1  ;;  %s32_s12 = int_to_ptr.vmem [resolvable:$true] %s31_s12 }
   0xf   :  { %s62_s13 = scalar_lea.vmem %s32_s12, 256  ;;  %p67_p6 = scmp.lt.s32.totalorder %s32_s12, %s32_s12 }
  0x10   :  { %p63_p5 = scmp.ne.s32.totalorder %s32_s12, %s62_s13  ;;  %p68_p7 = scmp.lt.s32.totalorder %s62_s13, %s62_s13 }
  0x12   :  { %p69_p8 = por %p68_p7, %p67_p6 }
  0x14   :  { %p70_p9 = pnand %p69_p8, %p63_p5 }
  0x16   :  { %73 = shalt.err (!%p70_p9)
}
  0x17   :  { %34 = dma.vmem_to_hbm [thread:$0]  %s32_s12, 256, %s105_s1, [#allocation4]  }
  0x18   :  { %84 = dma.done.wait [#allocation4], 256  }
  0x19   :  { %85 = vsyncadd [#allocation4], 4294967040 }
  0x1a   :  { %38 = vsyncpa [#allocation3], 1 }
  0x1b   :  { %39 = vsyncpa [#allocation4], 1 }

</bundles_post_ra>
